<compile_context>
chip_gen: v7x
topology: tpu7x:2x2x1
jax: 0.10.0
libtpu: 0.0.40
codegen_flags: <defaults>
</compile_context>

<pallas_src>
import functools

import jax
import jax.numpy as jnp
from jax.experimental import pallas as pl
from jax.experimental.pallas import tpu as pltpu

HIDDEN = 256
VPU_LAYER1_MAX_DIN = 32   # up to this many input features, do layer 1 on the VPU


def _round_up(n, m):
    return ((n + m - 1) // m) * m


def dqn_kernel(x_ref, w1_ref, b1_ref, w2_ref, b2_ref, w3_ref, b3_ref, o_ref):
    x = x_ref[...]                         # (tb, d_in), f32
    d_in = x_ref.shape[1]

    if d_in <= VPU_LAYER1_MAX_DIN:
        # Layer 1 as d_in broadcast FMAs on the VPU.  An MXU matmul here would
        # be >95% zero-padded K work and would force a 128-wide x tile.
        acc = x[:, 0:1] * w1_ref[0:1, :]
        for k in range(1, d_in):
            acc = acc + x[:, k:k + 1] * w1_ref[k:k + 1, :]
    else:
        acc = jnp.dot(x.astype(jnp.bfloat16), w1_ref[...].astype(jnp.bfloat16),
                      preferred_element_type=jnp.float32)
    h1 = jnp.maximum(acc + b1_ref[...], 0.0)

    h2 = jnp.dot(h1.astype(jnp.bfloat16), w2_ref[...],
                 preferred_element_type=jnp.float32) + b2_ref[...]
    h2 = jnp.maximum(h2, 0.0)

    out = jnp.dot(h2.astype(jnp.bfloat16), w3_ref[...],
                  preferred_element_type=jnp.float32) + b3_ref[...]
    o_ref[...] = out.astype(o_ref.dtype)   # bf16 store: halves writeback DMA


def prepare_params(w1, b1, w2, b2, w3, b3):
    """One-time padding / casting of the parameters (off the hot path).

    Weights are (in_features, out_features) — the transpose of nn.Linear.weight,
    same semantics: y = x @ W + b.  Only the final output-feature dim is padded
    (to a multiple of 128); padded output columns are sliced off in the wrapper.
    """
    d_in, hidden = w1.shape
    d_out = w3.shape[1]
    dp_out = _round_up(d_out, 128)

    # Layer 1: tiny d_in -> keep f32 and unpadded (computed on the VPU);
    # large d_in -> bf16 for the MXU like the other layers.
    w1_dtype = jnp.float32 if d_in <= VPU_LAYER1_MAX_DIN else jnp.bfloat16
    w1_p = w1.astype(w1_dtype)
    w2_p = w2.astype(jnp.bfloat16)
    w3_p = jnp.zeros((hidden, dp_out), jnp.bfloat16).at[:, :d_out].set(
        w3.astype(jnp.bfloat16))
    b1_p = b1.reshape(1, -1).astype(jnp.float32)
    b2_p = b2.reshape(1, -1).astype(jnp.float32)
    b3_p = jnp.zeros((1, dp_out), jnp.float32).at[0, :d_out].set(
        b3.astype(jnp.float32))
    return (w1_p, b1_p, w2_p, b2_p, w3_p, b3_p)


def _batch_tiling(B):
    """Returns (tb, bp, n_steps)."""
    if B <= 256:
        # Launch-latency regime: one full-array block, no batch padding,
        # no extra wrapper ops.
        return B, B, 1
    # Throughput regime: even number of steps (v7x has 2 TensorCores), tiles of
    # at most 1024 rows, rounded to 16 for clean bf16 sublane packing.
    n_steps = 2
    while pl.cdiv(B, n_steps) > 1024:
        n_steps += 2
    tb = _round_up(pl.cdiv(B, n_steps), 16)
    return tb, n_steps * tb, n_steps


@functools.partial(jax.jit, static_argnames=("output_size",))
def dqn_forward(x, padded_params, *, output_size):
    """x: (B, input_size). padded_params: output of prepare_params()."""
    w1, b1, w2, b2, w3, b3 = padded_params
    x = x.astype(jnp.float32)          # matches `x = x.float()`; no-op if f32
    B, d_in = x.shape
    dp_out = w3.shape[1]

    tb, bp, n_steps = _batch_tiling(B)
    x_p = x if bp == B else jnp.zeros((bp, d_in), jnp.float32).at[:B].set(x)

    const = lambda arr: pl.BlockSpec(arr.shape, lambda i: (0, 0))

    flops = 2 * bp * (d_in * HIDDEN + HIDDEN * HIDDEN + HIDDEN * dp_out)
    bytes_accessed = (
        bp * d_in * 4 + bp * dp_out * 2                       # activations in (f32) / out (bf16)
        + w1.size * w1.dtype.itemsize
        + (w2.size + w3.size) * 2                             # bf16 weights
        + (b1.size + b2.size + b3.size) * 4)                  # f32 biases

    out_p = pl.pallas_call(
        dqn_kernel,
        out_shape=jax.ShapeDtypeStruct((bp, dp_out), jnp.bfloat16),
        grid=(n_steps,),
        in_specs=[
            pl.BlockSpec((tb, d_in), lambda i: (i, 0)),       # x: tiled over batch
            const(w1), const(b1),                             # weights / biases stay
            const(w2), const(b2),                             # VMEM-resident across
            const(w3), const(b3),                             # grid steps
        ],
        out_specs=pl.BlockSpec((tb, dp_out), lambda i: (i, 0)),
        compiler_params=pltpu.CompilerParams(
            dimension_semantics=("parallel",)),
        cost_estimate=pl.CostEstimate(
            flops=flops, transcendentals=0, bytes_accessed=bytes_accessed),
    )(x_p, w1, b1, w2, b2, w3, b3)

    # Single fused slice + cast back to f32 (matches the torch module's dtype).
    return out_p[:B, :output_size].astype(jnp.float32)


def init_params(key, input_size, output_size):
    """Deterministic PyTorch-Linear-style init: U(-1/sqrt(fan_in), 1/sqrt(fan_in))."""
    sizes = [input_size, HIDDEN, HIDDEN, output_size]
    params = []
    for i in range(3):
        fan_in, fan_out = sizes[i], sizes[i + 1]
        key, kw, kb = jax.random.split(key, 3)
        bound = 1.0 / jnp.sqrt(jnp.float32(fan_in))
        w = jax.random.uniform(kw, (fan_in, fan_out), jnp.float32, -bound, bound)
        b = jax.random.uniform(kb, (fan_out,), jnp.float32, -bound, bound)
        params += [w, b]
    return params


if __name__ == "__main__":
    input_size, output_size, batch = 4, 2, 8  # CartPole-style DQN

    key = jax.random.PRNGKey(0)
    key, kx = jax.random.split(key)
    x = jax.random.normal(kx, (batch, input_size), jnp.float32)

    w1, b1, w2, b2, w3, b3 = init_params(key, input_size, output_size)
    padded_params = prepare_params(w1, b1, w2, b2, w3, b3)

    def ref_fwd(xx):
        h = jnp.maximum(xx @ w1 + b1, 0.0)
        h = jnp.maximum(h @ w2 + b2, 0.0)
        return h @ w3 + b3

    # Small-batch (single-block, launch-latency) path.
    out = dqn_forward(x, padded_params, output_size=output_size)
    out = jax.block_until_ready(out)
    ref = ref_fwd(x)
    assert out.shape == (batch, output_size)
    assert jnp.allclose(out, ref, atol=3e-2, rtol=3e-2), (
        f"max abs err {jnp.max(jnp.abs(out - ref))}")

    # Tiled multi-step (large-batch) path: exercises batch padding + even grid.
    x2 = jax.random.normal(jax.random.PRNGKey(1), (300, input_size), jnp.float32)
    out2 = jax.block_until_ready(
        dqn_forward(x2, padded_params, output_size=output_size))
    ref2 = ref_fwd(x2)
    assert out2.shape == (300, output_size)
    assert jnp.allclose(out2, ref2, atol=3e-2, rtol=3e-2), (
        f"max abs err {jnp.max(jnp.abs(out2 - ref2))}")

    print("KERNEL_OK")
</pallas_src>

<mosaic_0001>
module attributes {stable_mosaic.version = 11 : i64} {
  func.func @dqn_kernel(%arg0: i32, %arg1: memref<8x4xf32, #tpu.memory_space<vmem>>, %arg2: memref<4x256xf32, #tpu.memory_space<vmem>>, %arg3: memref<1x256xf32, #tpu.memory_space<vmem>>, %arg4: memref<256x256xbf16, #tpu.memory_space<vmem>>, %arg5: memref<1x256xf32, #tpu.memory_space<vmem>>, %arg6: memref<256x128xbf16, #tpu.memory_space<vmem>>, %arg7: memref<1x128xf32, #tpu.memory_space<vmem>>, %arg8: memref<8x128xbf16, #tpu.memory_space<vmem>>) attributes {dimension_semantics = [#tpu.dimension_semantics<parallel>], iteration_bounds = array<i64: 1>, scalar_prefetch = 0 : i64, scratch_operands = 0 : i64, tpu.core_type = #tpu.core_type<tc>, window_params = [{transform_indices = @transform_0, window_bounds = array<i64: 8, 4>}, {pipeline_mode = #tpu.pipeline_mode<synchronous>, transform_indices = @transform_1, window_bounds = array<i64: 4, 256>}, {pipeline_mode = #tpu.pipeline_mode<synchronous>, transform_indices = @transform_2, window_bounds = array<i64: 1, 256>}, {pipeline_mode = #tpu.pipeline_mode<synchronous>, transform_indices = @transform_3, window_bounds = array<i64: 256, 256>}, {pipeline_mode = #tpu.pipeline_mode<synchronous>, transform_indices = @transform_4, window_bounds = array<i64: 1, 256>}, {pipeline_mode = #tpu.pipeline_mode<synchronous>, transform_indices = @transform_5, window_bounds = array<i64: 256, 128>}, {pipeline_mode = #tpu.pipeline_mode<synchronous>, transform_indices = @transform_6, window_bounds = array<i64: 1, 128>}, {transform_indices = @transform_7, window_bounds = array<i64: 8, 128>}]} {
    %c0 = arith.constant 0 : index
    %c0_0 = arith.constant 0 : index
    %0 = vector.load %arg1[%c0, %c0_0] : memref<8x4xf32, #tpu.memory_space<vmem>>, vector<8x4xf32>
    %1 = vector.extract_strided_slice %0 {offsets = [0, 0], sizes = [8, 1], strides = [1, 1]} : vector<8x4xf32> to vector<8x1xf32>
    %c0_1 = arith.constant 0 : index
    %c0_2 = arith.constant 0 : index
    %2 = vector.load %arg2[%c0_1, %c0_2] : memref<4x256xf32, #tpu.memory_space<vmem>>, vector<1x256xf32>
    %3 = vector.broadcast %1 : vector<8x1xf32> to vector<8x256xf32>
    %4 = vector.broadcast %2 : vector<1x256xf32> to vector<8x256xf32>
    %5 = arith.mulf %3, %4 : vector<8x256xf32>
    %6 = vector.extract_strided_slice %0 {offsets = [0, 1], sizes = [8, 1], strides = [1, 1]} : vector<8x4xf32> to vector<8x1xf32>
    %c1 = arith.constant 1 : index
    %c0_3 = arith.constant 0 : index
    %7 = vector.load %arg2[%c1, %c0_3] : memref<4x256xf32, #tpu.memory_space<vmem>>, vector<1x256xf32>
    %8 = vector.broadcast %6 : vector<8x1xf32> to vector<8x256xf32>
    %9 = vector.broadcast %7 : vector<1x256xf32> to vector<8x256xf32>
    %10 = arith.mulf %8, %9 : vector<8x256xf32>
    %11 = arith.addf %5, %10 : vector<8x256xf32>
    %12 = vector.extract_strided_slice %0 {offsets = [0, 2], sizes = [8, 1], strides = [1, 1]} : vector<8x4xf32> to vector<8x1xf32>
    %c2 = arith.constant 2 : index
    %c0_4 = arith.constant 0 : index
    %13 = vector.load %arg2[%c2, %c0_4] : memref<4x256xf32, #tpu.memory_space<vmem>>, vector<1x256xf32>
    %14 = vector.broadcast %12 : vector<8x1xf32> to vector<8x256xf32>
    %15 = vector.broadcast %13 : vector<1x256xf32> to vector<8x256xf32>
    %16 = arith.mulf %14, %15 : vector<8x256xf32>
    %17 = arith.addf %11, %16 : vector<8x256xf32>
    %18 = vector.extract_strided_slice %0 {offsets = [0, 3], sizes = [8, 1], strides = [1, 1]} : vector<8x4xf32> to vector<8x1xf32>
    %c3 = arith.constant 3 : index
    %c0_5 = arith.constant 0 : index
    %19 = vector.load %arg2[%c3, %c0_5] : memref<4x256xf32, #tpu.memory_space<vmem>>, vector<1x256xf32>
    %20 = vector.broadcast %18 : vector<8x1xf32> to vector<8x256xf32>
    %21 = vector.broadcast %19 : vector<1x256xf32> to vector<8x256xf32>
    %22 = arith.mulf %20, %21 : vector<8x256xf32>
    %23 = arith.addf %17, %22 : vector<8x256xf32>
    %c0_6 = arith.constant 0 : index
    %c0_7 = arith.constant 0 : index
    %24 = vector.load %arg3[%c0_6, %c0_7] : memref<1x256xf32, #tpu.memory_space<vmem>>, vector<1x256xf32>
    %25 = vector.broadcast %24 : vector<1x256xf32> to vector<8x256xf32>
    %26 = arith.addf %23, %25 : vector<8x256xf32>
    %cst = arith.constant 0.000000e+00 : f32
    %27 = vector.broadcast %cst : f32 to vector<8x256xf32>
    %28 = arith.maximumf %26, %27 : vector<8x256xf32>
    %29 = arith.truncf %28 : vector<8x256xf32> to vector<8x256xbf16>
    %c0_8 = arith.constant 0 : index
    %c0_9 = arith.constant 0 : index
    %30 = vector.load %arg4[%c0_8, %c0_9] : memref<256x256xbf16, #tpu.memory_space<vmem>>, vector<256x256xbf16>
    %cst_10 = arith.constant dense<0.000000e+00> : vector<8x256xf32>
    %31 = tpu.matmul %29, %30, %cst_10 {dimension_numbers = #tpu.dot_dimension_numbers<[1], [0], [0], [1], [0, 0, 1, 1], [], []>} : vector<8x256xbf16>, vector<256x256xbf16>, vector<8x256xf32> -> vector<8x256xf32>
    %c0_11 = arith.constant 0 : index
    %c0_12 = arith.constant 0 : index
    %32 = vector.load %arg5[%c0_11, %c0_12] : memref<1x256xf32, #tpu.memory_space<vmem>>, vector<1x256xf32>
    %33 = vector.broadcast %32 : vector<1x256xf32> to vector<8x256xf32>
    %34 = arith.addf %31, %33 : vector<8x256xf32>
    %cst_13 = arith.constant 0.000000e+00 : f32
    %35 = vector.broadcast %cst_13 : f32 to vector<8x256xf32>
    %36 = arith.maximumf %34, %35 : vector<8x256xf32>
    %37 = arith.truncf %36 : vector<8x256xf32> to vector<8x256xbf16>
    %c0_14 = arith.constant 0 : index
    %c0_15 = arith.constant 0 : index
    %38 = vector.load %arg6[%c0_14, %c0_15] : memref<256x128xbf16, #tpu.memory_space<vmem>>, vector<256x128xbf16>
    %cst_16 = arith.constant dense<0.000000e+00> : vector<8x128xf32>
    %39 = tpu.matmul %37, %38, %cst_16 {dimension_numbers = #tpu.dot_dimension_numbers<[1], [0], [0], [1], [0, 0, 1, 1], [], []>} : vector<8x256xbf16>, vector<256x128xbf16>, vector<8x128xf32> -> vector<8x128xf32>
    %c0_17 = arith.constant 0 : index
    %c0_18 = arith.constant 0 : index
    %40 = vector.load %arg7[%c0_17, %c0_18] : memref<1x128xf32, #tpu.memory_space<vmem>>, vector<1x128xf32>
    %41 = vector.broadcast %40 : vector<1x128xf32> to vector<8x128xf32>
    %42 = arith.addf %39, %41 : vector<8x128xf32>
    %43 = arith.truncf %42 : vector<8x128xf32> to vector<8x128xbf16>
    %c0_19 = arith.constant 0 : index
    %c0_20 = arith.constant 0 : index
    %44 = vector.load %arg8[%c0_19, %c0_20] : memref<8x128xbf16, #tpu.memory_space<vmem>>, vector<8x128xbf16>
    tpu.vector_store %arg8[%c0_19, %c0_20], %43 {strides = array<i32>} : memref<8x128xbf16, #tpu.memory_space<vmem>>, vector<8x128xbf16>,
    return
  }
  func.func @transform_0(%arg0: i32) -> (i32, i32) {
    %c0_i32 = arith.constant 0 : i32
    %c0_i32_0 = arith.constant 0 : i32
    return %arg0, %c0_i32 : i32, i32
  }
  func.func @transform_1(%arg0: i32) -> (i32, i32) {
    %c0_i32 = arith.constant 0 : i32
    %c0_i32_0 = arith.constant 0 : i32
    %c0_i32_1 = arith.constant 0 : i32
    return %c0_i32, %c0_i32_0 : i32, i32
  }
  func.func @transform_2(%arg0: i32) -> (i32, i32) {
    %c0_i32 = arith.constant 0 : i32
    %c0_i32_0 = arith.constant 0 : i32
    %c0_i32_1 = arith.constant 0 : i32
    return %c0_i32, %c0_i32_0 : i32, i32
  }
  func.func @transform_3(%arg0: i32) -> (i32, i32) {
    %c0_i32 = arith.constant 0 : i32
    %c0_i32_0 = arith.constant 0 : i32
    %c0_i32_1 = arith.constant 0 : i32
    return %c0_i32, %c0_i32_0 : i32, i32
  }
  func.func @transform_4(%arg0: i32) -> (i32, i32) {
    %c0_i32 = arith.constant 0 : i32
    %c0_i32_0 = arith.constant 0 : i32
    %c0_i32_1 = arith.constant 0 : i32
    return %c0_i32, %c0_i32_0 : i32, i32
  }
  func.func @transform_5(%arg0: i32) -> (i32, i32) {
    %c0_i32 = arith.constant 0 : i32
    %c0_i32_0 = arith.constant 0 : i32
    %c0_i32_1 = arith.constant 0 : i32
    return %c0_i32, %c0_i32_0 : i32, i32
  }
  func.func @transform_6(%arg0: i32) -> (i32, i32) {
    %c0_i32 = arith.constant 0 : i32
    %c0_i32_0 = arith.constant 0 : i32
    %c0_i32_1 = arith.constant 0 : i32
    return %c0_i32, %c0_i32_0 : i32, i32
  }
  func.func @transform_7(%arg0: i32) -> (i32, i32) {
    %c0_i32 = arith.constant 0 : i32
    %c0_i32_0 = arith.constant 0 : i32
    return %arg0, %c0_i32 : i32, i32
  }
}

</mosaic_0001>

<bundles_post_ra>
// kernel: dqn_forward.1
= control target key start
LH: loop header
LB: loop body
LE: loop exit
PB: predicated region body
PF: predicated region fallthrough
CT: control target
= control target key end

     0   :  { %12 = vsyncpa [#allocation3], 0  ;;  %s890_s0 = inlined_call_operand.vmem [shape: f32[8,4], index: 0, kind: input, shape index: {}]   ;;  %s891_s1 = inlined_call_operand.vmem [shape: f32[4,256], index: 1, kind: input, shape index: {}]   ;;  %s892_s2 = inlined_call_operand.vmem [shape: f32[1,256], index: 2, kind: input, shape index: {}]   ;;  %s893_s3 = inlined_call_operand.hbm [shape: bf16[256,256], index: 3, kind: input, shape index: {}]   ;;  %s894_s4 = inlined_call_operand.vmem [shape: f32[1,256], index: 4, kind: input, shape index: {}]   ;;  %s895_s5 = inlined_call_operand.hbm [shape: bf16[256,128], index: 5, kind: input, shape index: {}]   ;;  %s896_s6 = inlined_call_operand.vmem [shape: f32[1,128], index: 6, kind: input, shape index: {}]   ;;  %s897_s7 = inlined_call_operand.vmem [shape: bf16[8,128], index: 7, kind: output, shape index: {}]  }
   0x1   :  { %13 = vsyncpa [#allocation5], 0  ;;  %s789_s24 = smov [#allocation2]   ;;  %s741_s28 = scalar_lea.hbm %s893_s3, 4096 }
   0x2   :  { %s25_s25 = sshll.u32 %s789_s24, 4  ;;  %p742_p0 = scmp.ne.s32.totalorder %s893_s3, %s741_s28  ;;  %s26_s25 = int_to_ptr.vmem [resolvable:$true] %s25_s25 }
   0x3   :  { %p745_p1 = scmp.lt.u32.totalorder %s741_s28, %s893_s3 }
   0x5   :  { %p747_p2 = pnand %p745_p1, %p742_p0 }
   0x7   :  { %750 = shalt.err (!%p747_p2)
}
   0x8   :  { %s751_s10 = scalar_lea.vmem %s26_s25, 4096  ;;  %p756_p4 = scmp.lt.s32.totalorder %s26_s25, %s26_s25 }
   0x9   :  { %p752_p3 = scmp.ne.s32.totalorder %s26_s25, %s751_s10  ;;  %p757_p5 = scmp.lt.s32.totalorder %s751_s10, %s751_s10 }
   0xb   :  { %p758_p6 = por %p757_p5, %p756_p4 }
   0xd   :  { %p759_p7 = pnand %p758_p6, %p752_p3 }
   0xf   :  { %762 = shalt.err (!%p759_p7)
}
  0x10   :  { %s790_s11 = smov 128   ;;  %s791_s12 = smov 8  }
  0x11   :  { %31 = dma.hbm_to_vmem [thread:$0]  %s893_s3, 4096, %s26_s25, [#allocation3], %s790_s11, %s790_s11, %s791_s12  }
  0x12   :  { %s792_s15 = smov [#allocation4]   ;;  %s763_s19 = scalar_lea.hbm %s895_s5, 2048 }
  0x13   :  { %s39_s16 = sshll.u32 %s792_s15, 4  ;;  %p764_p8 = scmp.ne.s32.totalorder %s895_s5, %s763_s19  ;;  %s40_s16 = int_to_ptr.vmem [resolvable:$true] %s39_s16 }
  0x14   :  { %p767_p9 = scmp.lt.u32.totalorder %s763_s19, %s895_s5 }
  0x16   :  { %p769_p10 = pnand %p767_p9, %p764_p8 }
  0x18   :  { %772 = shalt.err (!%p769_p10)
}
  0x19   :  { %s773_s24 = scalar_lea.vmem %s40_s16, 2048  ;;  %p778_p12 = scmp.lt.s32.totalorder %s40_s16, %s40_s16 }
  0x1a   :  { %p774_p11 = scmp.ne.s32.totalorder %s40_s16, %s773_s24  ;;  %p779_p13 = scmp.lt.s32.totalorder %s773_s24, %s773_s24 }
  0x1c   :  { %p780_p0 = por %p779_p13, %p778_p12 }
  0x1e   :  { %p781_p1 = pnand %p780_p0, %p774_p11 }
  0x20   :  { %784 = shalt.err (!%p781_p1)
}
  0x21   :  { %s793_s3 = smov 64   ;;  %s794_s25 = smov 4  }
  0x22   :  { %45 = dma.hbm_to_vmem [thread:$0]  %s895_s5, 2048, %s40_s16, [#allocation5], %s793_s3, %s793_s3, %s794_s25  }
  0x23   :  { %785 = dma.done.wait [#allocation3], 4096  }
  0x24   :  { %786 = vsyncadd [#allocation3], 4294963200 }
  0x25   :  { %787 = dma.done.wait [#allocation5], 2048  }
  0x26   :  { %788 = vsyncadd [#allocation5], 4294965248  ;;  %v795_v0 = vmov 0   ;;  %v796_v1 = vmov 2   ;;  %v55_v2 = vld [vmem:[%s890_s0] sm:$0xff]  ;;  %v797_v7 = vmov 1   ;;  %v63_v49 = vlaneseq }
  0x27   :  { %672 = vset.pattern.permute.xlu0 %v795_v0  ;;  %674 = vset.pattern.permute.xlu1 %v796_v1  ;;  %v677_v3 = vld [vmem:[#allocation2 + $0x4] ss:$8 sps:$4 sm:$0xff]   ;;  %v679_v4 = vld [vmem:[#allocation2] ss:$8 sps:$4 sm:$0xff]   ;;  %v680_v5 = vld [vmem:[#allocation2 + $0x14] ss:$8 sps:$4 sm:$0xff]  }
  0x28   :  { %59 = vperm.xlu0 %672, %v55_v2   ;;  %99 = vperm.xlu1 %674, %v55_v2   ;;  %v682_v6 = vld [vmem:[#allocation2 + $0x10] ss:$8 sps:$4 sm:$0xff]   ;;  %v798_v8 = vmov 3   ;;  %v683_v9 = vld [vmem:[#allocation2 + $0x24] ss:$8 sps:$4 sm:$0xff]   ;;  %v64_v50 = vshrl.u32 %v63_v49, 7 }
  0x29   :  { %360 = vmatprep.subr.bf16.mxu0 %v677_v3  ;;  %v685_v10 = vld [vmem:[#allocation2 + $0x20] ss:$8 sps:$4 sm:$0xff]   ;;  %v686_v11 = vld [vmem:[#allocation2 + $0x34] ss:$8 sps:$4 sm:$0xff]   ;;  %v688_v12 = vld [vmem:[#allocation2 + $0x30] ss:$8 sps:$4 sm:$0xff]  }
  0x2a   :  { %361 = vmatpush1.bf16.msra.mxu0 %v679_v4  ;;  %v689_v13 = vld [vmem:[#allocation2 + $0x44] ss:$8 sps:$4 sm:$0xff]   ;;  %v691_v14 = vld [vmem:[#allocation2 + $0x40] ss:$8 sps:$4 sm:$0xff]   ;;  %v692_v15 = vld [vmem:[#allocation2 + $0x54] ss:$8 sps:$4 sm:$0xff]  }
  0x2b   :  { %362 = vmatprep.subr.bf16.mxu0 %v680_v5  ;;  %v694_v16 = vld [vmem:[#allocation2 + $0x50] ss:$8 sps:$4 sm:$0xff]   ;;  %v695_v17 = vld [vmem:[#allocation2 + $0x64] ss:$8 sps:$4 sm:$0xff]   ;;  %v697_v18 = vld [vmem:[#allocation2 + $0x60] ss:$8 sps:$4 sm:$0xff]  }
  0x2c   :  { %673 = vset.pattern.permute.xlu0 %v797_v7  ;;  %675 = vset.pattern.permute.xlu1 %v798_v8  ;;  %v698_v19 = vld [vmem:[#allocation2 + $0x74] ss:$8 sps:$4 sm:$0xff]   ;;  %v725_v20 = vld [vmem:[#allocation4 + $0x40] sm:$0xff]   ;;  %v700_v22 = vld [vmem:[#allocation2 + $0x70] ss:$8 sps:$4 sm:$0xff]   ;;  %v65_v51 = vsub.s32 0, %v64_v50 }
  0x2d   :  { %78 = vperm.xlu0 %673, %v55_v2   ;;  %120 = vperm.xlu1 %675, %v55_v2   ;;  %v726_v21 = vld [vmem:[#allocation4] sm:$0xff]   ;;  %v727_v23 = vld [vmem:[#allocation4 + $0x48] sm:$0xff]   ;;  %v729_v25 = vld [vmem:[#allocation4 + $0x50] sm:$0xff]   ;;  %v69_v52 = vsub.s32 1, %v64_v50 }
  0x2e   :  { %363 = vmatpush1.bf16.msra.mxu0 %v682_v6  ;;  %640 = vmatprep.subr.bf16.mxu1 %v725_v20  ;;  %v728_v24 = vld [vmem:[#allocation4 + $0x8] sm:$0xff]   ;;  %v730_v28 = vld [vmem:[#allocation4 + $0x10] sm:$0xff]   ;;  %v731_v29 = vld [vmem:[#allocation4 + $0x58] sm:$0xff]  }
  0x2f   :  { %364 = vmatprep.subr.bf16.mxu0 %v683_v9  ;;  %641 = vmatpush3.bf16.msra.mxu1 %v726_v21  ;;  %v701_v26 = vld [vmem:[#allocation2 + $0x84] ss:$8 sps:$4 sm:$0xff]   ;;  %v703_v27 = vld [vmem:[#allocation2 + $0x80] ss:$8 sps:$4 sm:$0xff]   ;;  %v704_v30 = vld [vmem:[#allocation2 + $0x94] ss:$8 sps:$4 sm:$0xff]  }
  0x30   :  { %642 = vmatprep.subr.bf16.mxu1 %v727_v23  ;;  %v706_v31 = vld [vmem:[#allocation2 + $0x90] ss:$8 sps:$4 sm:$0xff]   ;;  %v707_v32 = vld [vmem:[#allocation2 + $0xa4] ss:$8 sps:$4 sm:$0xff]   ;;  %v709_v36 = vld [vmem:[#allocation2 + $0xa0] ss:$8 sps:$4 sm:$0xff]  }
  0x31   :  { %676 = vset.pattern.permute.xlu0 %v798_v8  ;;  %v732_v33 = vld [vmem:[#allocation4 + $0x18] sm:$0xff]   ;;  %v733_v34 = vld [vmem:[#allocation4 + $0x60] sm:$0xff]   ;;  %v735_v37 = vld [vmem:[#allocation4 + $0x68] sm:$0xff]  }
  0x32   :  { %365 = vmatpush1.bf16.msra.mxu0 %v685_v10  ;;  %v734_v35 = vld [vmem:[#allocation4 + $0x20] sm:$0xff]   ;;  %v710_v38 = vld [vmem:[#allocation2 + $0xb4] ss:$8 sps:$4 sm:$0xff]   ;;  %v736_v39 = vld [vmem:[#allocation4 + $0x28] sm:$0xff]  }
  0x33   :  { %366 = vmatprep.subr.bf16.mxu0 %v686_v11  ;;  %643 = vmatpush3.bf16.msra.mxu1 %v728_v24  ;;  %v712_v40 = vld [vmem:[#allocation2 + $0xb0] ss:$8 sps:$4 sm:$0xff]   ;;  %v713_v41 = vld [vmem:[#allocation2 + $0xc4] ss:$8 sps:$4 sm:$0xff]   ;;  %v715_v42 = vld [vmem:[#allocation2 + $0xc0] ss:$8 sps:$4 sm:$0xff]  }
  0x34   :  { %644 = vmatprep.subr.bf16.mxu1 %v729_v25  ;;  %v716_v43 = vld [vmem:[#allocation2 + $0xd4] ss:$8 sps:$4 sm:$0xff]   ;;  %v718_v44 = vld [vmem:[#allocation2 + $0xd0] ss:$8 sps:$4 sm:$0xff]   ;;  %v719_v45 = vld [vmem:[#allocation2 + $0xe4] ss:$8 sps:$4 sm:$0xff]  }
  0x35   :  { %v721_v46 = vld [vmem:[#allocation2 + $0xe0] ss:$8 sps:$4 sm:$0xff]   ;;  %v722_v47 = vld [vmem:[#allocation2 + $0xf4] ss:$8 sps:$4 sm:$0xff]   ;;  %v724_v48 = vld [vmem:[#allocation2 + $0xf0] ss:$8 sps:$4 sm:$0xff]  }
  0x36   :  { %367 = vmatpush1.bf16.msra.mxu0 %v688_v12  ;;  %v56_v53 = vld [vmem:[%s891_s1] ss:$4 sm:$0x3]  ;;  %v588_v54 = vld [vmem:[%s891_s1 + $0x1] ss:$4 sm:$0x3] }
  0x37   :  { %368 = vmatprep.subr.bf16.mxu0 %v689_v13  ;;  %645 = vmatpush3.bf16.msra.mxu1 %v730_v28  ;;  %v589_v56 = vld [vmem:[%s891_s1 + $0x2] ss:$4 sm:$0x3]  ;;  %v590_v58 = vld [vmem:[%s891_s1 + $0x3] ss:$4 sm:$0x3]  ;;  %v66_v59 = vrot.slane %v56_v53, %v65_v51  ;;  %v70_v60 = vrot.slane %v56_v53, %v69_v52  ;;  %v85_v61 = vrot.slane %v588_v54, %v65_v51 }
  0x38   :  { %646 = vmatprep.subr.bf16.mxu1 %v731_v29  ;;  %v89_v62 = vrot.slane %v588_v54, %v69_v52  ;;  %v106_v63 = vrot.slane %v589_v56, %v65_v51  ;;  %v110_v0 = vrot.slane %v589_v56, %v69_v52  ;;  %v127_v1 = vrot.slane %v590_v58, %v65_v51  ;;  %v138_v11 = vld [vmem:[%s892_s2] sm:$0x3]  ;;  %v737_v28 = vld [vmem:[#allocation4 + $0x70] sm:$0xff]  }
  0x39   :  { %v131_v2 = vrot.slane %v590_v58, %v69_v52  ;;  %v738_v29 = vld [vmem:[#allocation4 + $0x30] sm:$0xff]  }
  0x3a   :  { %369 = vmatpush1.bf16.msra.mxu0 %v691_v14 }
  0x3b   :  { %370 = vmatprep.subr.bf16.mxu0 %v692_v15  ;;  %647 = vmatpush3.bf16.msra.mxu1 %v732_v33 }
  0x3c   :  { %648 = vmatprep.subr.bf16.mxu1 %v733_v34 }
  0x3e   :  { %371 = vmatpush1.bf16.msra.mxu0 %v694_v16 }
  0x3f   :  { %372 = vmatprep.subr.bf16.mxu0 %v695_v17  ;;  %649 = vmatpush3.bf16.msra.mxu1 %v734_v35 }
  0x40   :  { %650 = vmatprep.subr.bf16.mxu1 %v735_v37 }
  0x42   :  { %373 = vmatpush1.bf16.msra.mxu0 %v697_v18  ;;  %v143_v18 = vrot.slane %v138_v11, %v65_v51 }
  0x43   :  { %374 = vmatprep.subr.bf16.mxu0 %v698_v19  ;;  %651 = vmatpush3.bf16.msra.mxu1 %v736_v39  ;;  %v147_v19 = vrot.slane %v138_v11, %v69_v52 }
  0x44   :  { %652 = vmatprep.subr.bf16.mxu1 %v737_v28 }
  0x46   :  { %375 = vmatpush1.bf16.msra.mxu0 %v700_v22 }
  0x47   :  { %376 = vmatprep.subr.bf16.mxu0 %v701_v26  ;;  %653 = vmatpush3.bf16.msra.mxu1 %v738_v29 }
  0x4a   :  { %377 = vmatpush1.bf16.msra.mxu0 %v703_v27 }
  0x4b   :  { %378 = vmatprep.subr.bf16.mxu0 %v704_v30  ;;  %v739_v30 = vld [vmem:[#allocation4 + $0x78] sm:$0xff]  }
  0x4c   :  { %654 = vmatprep.subr.bf16.mxu1 %v739_v30 }
  0x4e   :  { %379 = vmatpush1.bf16.msra.mxu0 %v706_v31  ;;  %v740_v31 = vld [vmem:[#allocation4 + $0x38] sm:$0xff]  }
  0x4f   :  { %380 = vmatprep.subr.bf16.mxu0 %v707_v32  ;;  %655 = vmatpush3.bf16.msra.mxu1 %v740_v31  ;;  %v188_v32 = vld [vmem:[%s894_s4] sm:$0x3] }
  0x50   :  { %v193_v33 = vrot.slane %v188_v32, %v65_v51  ;;  %v197_v34 = vrot.slane %v188_v32, %v69_v52 }
  0x52   :  { %381 = vmatpush1.bf16.msra.mxu0 %v709_v36 }
  0x53   :  { %382 = vmatprep.subr.bf16.mxu0 %v710_v38 }
  0x56   :  { %383 = vmatpush1.bf16.msra.mxu0 %v712_v40 }
  0x57   :  { %384 = vmatprep.subr.bf16.mxu0 %v713_v41 }
  0x5a   :  { %385 = vmatpush1.bf16.msra.mxu0 %v715_v42 }
  0x5b   :  { %386 = vmatprep.subr.bf16.mxu0 %v716_v43 }
  0x5e   :  { %387 = vmatpush1.bf16.msra.mxu0 %v718_v44 }
  0x5f   :  { %388 = vmatprep.subr.bf16.mxu0 %v719_v45 }
  0x62   :  { %389 = vmatpush1.bf16.msra.mxu0 %v721_v46  ;;  %v623_v46 = vld [vmem:[%s896_s6] ss:$0 sm:$0xff] }
  0x63   :  { %390 = vmatprep.subr.bf16.mxu0 %v722_v47 }
  0x66   :  { %391 = vmatpush1.bf16.msra.mxu0 %v724_v48 }
  0xa7   :  { %v60_v55 = vpop.permute.xlu0 %59  ;;  %v100_v57 = vpop.permute.xlu1 %99 }
  0xa8   :  { %v73_v5 = vmul.f32 %v66_v59, %v60_v55  ;;  %v74_v6 = vmul.f32 %v70_v60, %v60_v55  ;;  %v113_v9 = vmul.f32 %v106_v63, %v100_v57  ;;  %v114_v10 = vmul.f32 %v110_v0, %v100_v57 }
  0xac   :  { %v79_v3 = vpop.permute.xlu0 %78  ;;  %v121_v4 = vpop.permute.xlu1 %120 }
  0xad   :  { %v92_v7 = vmul.f32 %v85_v61, %v79_v3  ;;  %v93_v8 = vmul.f32 %v89_v62, %v79_v3  ;;  %v134_v14 = vmul.f32 %v127_v1, %v121_v4  ;;  %v135_v15 = vmul.f32 %v131_v2, %v121_v4 }
  0xaf   :  { %v94_v12 = vadd.f32 %v92_v7, %v73_v5  ;;  %v95_v13 = vadd.f32 %v93_v8, %v74_v6 }
  0xb1   :  { %v115_v16 = vadd.f32 %v113_v9, %v94_v12  ;;  %v116_v17 = vadd.f32 %v114_v10, %v95_v13 }
  0xb3   :  { %v136_v20 = vadd.f32 %v134_v14, %v115_v16  ;;  %v137_v21 = vadd.f32 %v135_v15, %v116_v17 }
  0xb5   :  { %v151_v22 = vadd.f32 %v147_v19, %v137_v21  ;;  %v150_v23 = vadd.f32 %v143_v18, %v136_v20 }
  0xb7   :  { %v153_v24 = vmax.f32 %v151_v22, 0.0  ;;  %v152_v25 = vmax.f32 %v150_v23, 0.0 }
  0xb9   :  { %v155_v26 = vpack.c.bf16 %v153_v24, %v153_v24  ;;  %v154_v27 = vpack.c.bf16 %v152_v25, %v152_v25 }
  0xbb   :  { %392 = vmatprep.mubr.bf16.mxu0 %v155_v26 }
  0xbc   :  { %393 = vmatmul.mubr.bf16.vlgmr.msra.gmra.mrb[0].mxu0 %v154_v27 }
 0x18f   :  { %v394_v35 = vpop.f32.mrb[0].mxu0 }
 0x190   :  { %v395_v36 = vadd.f32 %v394_v35, %v193_v33  ;;  %v396_v37 = vpop.f32.mrb[1].mxu0 }
 0x191   :  { %v397_v38 = vadd.f32 %v396_v37, %v197_v34  ;;  %v398_v39 = vpop.f32.mrb[2].mxu0 }
 0x192   :  { %v401_v40 = vmax.f32 %v395_v36, 0.0  ;;  %v399_v41 = vpop.f32.mrb[3].mxu0 }
 0x193   :  { %v402_v42 = vmax.f32 %v397_v38, 0.0 }
 0x194   :  { %v403_v44 = vpack.c.bf16 %v401_v40, %v401_v40 }
 0x195   :  { %v404_v43 = vpack.c.bf16 %v402_v42, %v402_v42 }
 0x197   :  { %572 = vmatprep.mubr.bf16.mxu1 %v404_v43 }
 0x198   :  { %573 = vmatmul.mubr.bf16.vlgmr.msra.gmra.mrb[0].mxu1 %v403_v44 }
 0x26b   :  { %v656_v45 = vpop.f32.mrb[0].mxu1 }
 0x26c   :  { %v657_v47 = vpop.f32.mrb[1].mxu1 }
 0x26d   :  { %v658_v48 = vadd.f32 %v657_v47, %v656_v45  ;;  %v659_v49 = vpop.f32.mrb[2].mxu1 }
 0x26e   :  { %v660_v50 = vpop.f32.mrb[3].mxu1 }
 0x26f   :  { %v575_v51 = vadd.f32 %v658_v48, %v623_v46 }
 0x271   :  { %v580_v52 = vpack.c.bf16 %v575_v51, %v575_v51 }
 0x273   :  { %581 = vst [vmem:[%s897_s7] sm:$0xf] %v580_v52 }
 0x274   :  { %586 = vsyncpa [#allocation3], 1 }
 0x275   :  { %587 = vsyncpa [#allocation5], 1 }

</bundles_post_ra>
